<compile_context>
chip_gen: v5e
topology: v5e:2x2
jax: 0.10.0
libtpu: 0.0.40
codegen_flags: <defaults>
</compile_context>

<pallas_src>
import jax
import jax.numpy as jnp
from jax.experimental import pallas as pl
from jax.experimental.pallas import tpu as pltpu

_LANE = 128


def _cls_pool_head_kernel(x_ref, w_ref, b_ref, o_ref, pool_ref, logits_ref):
    # Grid: (batch_tile i, channel c, spatial_tile k)
    #   x_ref:      [tb, ts]      current (batch-tile, channel, spatial-tile) slab
    #   w_ref:      [C_in, Cpad]  head weights, pre-scaled by 1/(H*W), zero-padded
    #   b_ref:      [1, Cpad]     bias, zero-padded
    #   o_ref:      [tb, Cpad]    logits output block (lane-dense)
    #   pool_ref:   [tb, 1]       running spatial sum for the current channel
    #   logits_ref: [tb, Cpad]    running logits accumulator for this batch tile
    c = pl.program_id(1)
    k = pl.program_id(2)
    nc = pl.num_programs(1)
    nk = pl.num_programs(2)

    @pl.when((c == 0) & (k == 0))
    def _():
        # Bias folded into the accumulator init -> final step is a plain store.
        logits_ref[...] = jnp.broadcast_to(b_ref[...], logits_ref.shape)

    @pl.when(k == 0)
    def _():
        pool_ref[...] = jnp.zeros_like(pool_ref)

    # Memory-bound sweep of x: lane reduction of this spatial tile (f32 accum).
    x = x_ref[...].astype(jnp.float32)                        # [tb, ts]
    pool_ref[...] += jnp.sum(x, axis=-1, keepdims=True)       # [tb, 1]

    # After the last spatial tile of channel c: fold the pooled sum into the
    # logits with a broadcast FMA on the VPU.  Static unroll over channels
    # (C_in is small: RGB).
    last_k = k == nk - 1
    for ci in range(w_ref.shape[0]):
        @pl.when(last_k & (c == ci))
        def _(ci=ci):
            # w is pre-scaled by 1/(H*W): pooled-sum * w == mean * original-w.
            logits_ref[...] += pool_ref[...] * w_ref[ci:ci + 1, :]

    @pl.when((c == nc - 1) & last_k)
    def _():
        o_ref[...] = logits_ref[...].astype(o_ref.dtype)


def _pick_batch_tile(B, cap=128):
    """Batch tile: multiple of 8 dividing B (packed sublanes), else full B."""
    if B % 8 != 0:
        return B
    t = 8
    while t * 2 <= min(B, cap) and B % (t * 2) == 0:
        t *= 2
    return t


def _pick_spatial_tiling(hw, tb, target_lanes, vmem_budget_bytes=8 << 20):
    """Return (ts, hw_pad): spatial tile (multiple of 128 lanes) and padded HW.

    Prefers an exact divisor of the 128-padded extent (no extra zero traffic);
    if only tiny divisors exist, pads HW up to a multiple of a near-cap tile
    (<= 1/16 extra zero reads) so the per-grid-step overhead stays amortized.
    Tile is also capped so the double-buffered f32 x slab fits the budget.
    """
    hw128 = pl.cdiv(hw, _LANE) * _LANE
    by_vmem = max(_LANE, ((vmem_budget_bytes // (2 * 4 * max(tb, 1))) // _LANE) * _LANE)
    cap = max(_LANE, (min(target_lanes, hw128, by_vmem) // _LANE) * _LANE)

    # 1) Largest 128-multiple divisor of hw128 that is <= cap.
    best_div = _LANE
    for k in range(1, hw128 // _LANE + 1):
        ts = k * _LANE
        if ts > cap:
            break
        if hw128 % ts == 0:
            best_div = ts
    if best_div * 8 >= cap:                 # divisor is within 8x of the cap: use it
        return best_div, hw128

    # 2) Otherwise pad HW up to a multiple of a near-cap tile (bounded waste).
    ts = cap
    while ts > best_div:
        hw_pad = pl.cdiv(hw128, ts) * ts
        if (hw_pad - hw128) * 16 <= hw128:  # <= 1/16 extra zero reads
            return ts, hw_pad
        ts -= _LANE
    return best_div, hw128


def cls_model_forward(x_nchw, w, b, *, spatial_tile_target=8192, batch_tile=None):
    """x_nchw: [B, 3, H, W] float in [0,1]; w: [C_in, C]; b: [C] -> [B, C] logits."""
    B, C_in, H, W = x_nchw.shape
    HW = H * W
    C = w.shape[1]

    # ---- tiling --------------------------------------------------------------
    tb = batch_tile if batch_tile is not None else _pick_batch_tile(B)
    assert B % tb == 0, "batch tile must divide B"
    nb = B // tb
    ts, HW_pad = _pick_spatial_tiling(HW, tb, spatial_tile_target)
    nk = HW_pad // ts
    grid = (nb, C_in, nk)

    # ---- wrapper-side layout & parameter transforms (cheap, one-time) -------
    # Zero-pad the per-channel spatial axis (zeros do not change the pooled
    # sum; the 1/(H*W) scale below uses the true HW).
    x3 = x_nchw.reshape(B, C_in, HW)
    if HW_pad != HW:
        x3 = jnp.pad(x3, ((0, 0), (0, 0), (0, HW_pad - HW)))
    # Lane-dense 2-D view: batch on sublanes, channel-major spatial on lanes.
    x2d = x3.reshape(B, C_in * HW_pad)

    # Fold the mean scale into the weights; pad the class dim to 128 so the
    # output store path is unmasked (lane-dense vst).
    C_pad = pl.cdiv(C, _LANE) * _LANE
    w_scaled = w.astype(jnp.float32) * (1.0 / float(HW))
    w_pad = jnp.zeros((C_in, C_pad), jnp.float32).at[:, :C].set(w_scaled)
    b_pad = jnp.zeros((1, C_pad), jnp.float32).at[:, :C].set(
        b.astype(jnp.float32).reshape(1, C))

    cost = pl.CostEstimate(
        flops=B * C_in * HW_pad + 2 * B * C_in * C_pad,
        transcendentals=0,
        bytes_accessed=(x2d.size * x2d.dtype.itemsize
                        + B * C_pad * 4
                        + w_pad.size * 4
                        + b_pad.size * 4),
    )

    out = pl.pallas_call(
        _cls_pool_head_kernel,
        out_shape=jax.ShapeDtypeStruct((B, C_pad), jnp.float32),
        grid_spec=pltpu.PrefetchScalarGridSpec(
            num_scalar_prefetch=0,
            grid=grid,
            in_specs=[
                # x tile: batch-tile i, channel c, spatial chunk k of channel c.
                pl.BlockSpec((tb, ts), lambda i, c, k: (i, c * nk + k)),
                pl.BlockSpec((C_in, C_pad), lambda i, c, k: (0, 0)),
                pl.BlockSpec((1, C_pad), lambda i, c, k: (0, 0)),
            ],
            out_specs=pl.BlockSpec((tb, C_pad), lambda i, c, k: (i, 0)),
            scratch_shapes=[
                pltpu.VMEM((tb, 1), jnp.float32),       # per-channel pooled sum
                pltpu.VMEM((tb, C_pad), jnp.float32),   # logits accumulator
            ],
        ),
        compiler_params=pltpu.CompilerParams(
            dimension_semantics=("parallel", "arbitrary", "arbitrary"),
        ),
        cost_estimate=cost,
    )(x2d, w_pad, b_pad)

    return out[:, :C]


if __name__ == "__main__":
    # Deterministic synthetic parameters (no checkpoint loading).
    B, C_in, H, W = 2, 3, 16, 16
    NUM_CLASSES = 10  # num_classes(); head_features() == C_in == 3

    key = jax.random.PRNGKey(0)
    kx, kw, kb = jax.random.split(key, 3)
    x = jax.random.uniform(kx, (B, C_in, H, W), dtype=jnp.float32)  # image in [0,1]
    w = jax.random.normal(kw, (C_in, NUM_CLASSES), dtype=jnp.float32) * 0.1
    b = jax.random.normal(kb, (NUM_CLASSES,), dtype=jnp.float32) * 0.01

    # Small spatial tile target so the demo exercises the multi-step reduction
    # (grid = (1 batch tile, 3 channels, 2 spatial tiles)).
    logits = cls_model_forward(x, w, b, spatial_tile_target=128)
    jax.block_until_ready(logits)

    # Sanity check against a pure-JAX reference of the same forward pass.
    ref = jnp.mean(x.reshape(B, C_in, H * W), axis=-1) @ w + b
    assert logits.shape == (B, NUM_CLASSES)
    assert jnp.allclose(logits, ref, atol=1e-4), "mismatch vs. reference"

    # Also exercise the large-tile / single-spatial-step path.
    logits2 = cls_model_forward(x, w, b)
    jax.block_until_ready(logits2)
    assert jnp.allclose(logits2, ref, atol=1e-4), "mismatch vs. reference (big tile)"

    print("KERNEL_OK")
</pallas_src>

<mosaic_0001>
module attributes {stable_mosaic.version = 11 : i64} {
  func.func @_cls_pool_head_kernel(%arg0: i32, %arg1: i32, %arg2: i32, %arg3: memref<2x128xf32, #tpu.memory_space<vmem>>, %arg4: memref<3x128xf32, #tpu.memory_space<vmem>>, %arg5: memref<1x128xf32, #tpu.memory_space<vmem>>, %arg6: memref<2x128xf32, #tpu.memory_space<vmem>>, %arg7: memref<2x1xf32, #tpu.memory_space<vmem>>, %arg8: memref<2x128xf32, #tpu.memory_space<vmem>>) attributes {dimension_semantics = [#tpu.dimension_semantics<parallel>, #tpu.dimension_semantics<arbitrary>, #tpu.dimension_semantics<arbitrary>], iteration_bounds = array<i64: 1, 3, 2>, scalar_prefetch = 0 : i64, scratch_operands = 2 : i64, tpu.core_type = #tpu.core_type<tc>, window_params = [{transform_indices = @transform_0, window_bounds = array<i64: 2, 128>}, {pipeline_mode = #tpu.pipeline_mode<synchronous>, transform_indices = @transform_1, window_bounds = array<i64: 3, 128>}, {pipeline_mode = #tpu.pipeline_mode<synchronous>, transform_indices = @transform_2, window_bounds = array<i64: 1, 128>}, {transform_indices = @transform_3, window_bounds = array<i64: 2, 128>}]} {
    %c0_i32 = arith.constant 0 : i32
    %0 = arith.cmpi eq, %arg1, %c0_i32 : i32
    %c0_i32_0 = arith.constant 0 : i32
    %1 = arith.cmpi eq, %arg2, %c0_i32_0 : i32
    %2 = arith.andi %0, %1 : i1
    %3 = arith.extui %2 : i1 to i32
    %c0_i32_1 = arith.constant 0 : i32
    %4 = arith.cmpi ne, %3, %c0_i32_1 : i32
    scf.if %4 {
      %c0_16 = arith.constant 0 : index
      %c0_17 = arith.constant 0 : index
      %31 = vector.load %arg5[%c0_16, %c0_17] : memref<1x128xf32, #tpu.memory_space<vmem>>, vector<1x128xf32>
      %32 = vector.shape_cast %31 : vector<1x128xf32> to vector<1x128xf32>
      %33 = vector.broadcast %32 : vector<1x128xf32> to vector<2x128xf32>
      %c0_18 = arith.constant 0 : index
      %c0_19 = arith.constant 0 : index
      %34 = vector.load %arg8[%c0_18, %c0_19] : memref<2x128xf32, #tpu.memory_space<vmem>>, vector<2x128xf32>
      tpu.vector_store %arg8[%c0_18, %c0_19], %33 {strides = array<i32>} : memref<2x128xf32, #tpu.memory_space<vmem>>, vector<2x128xf32>,
    } else {
    }
    %c0_i32_2 = arith.constant 0 : i32
    %5 = arith.cmpi eq, %arg2, %c0_i32_2 : i32
    %6 = arith.extui %5 : i1 to i32
    %c0_i32_3 = arith.constant 0 : i32
    %7 = arith.cmpi ne, %6, %c0_i32_3 : i32
    scf.if %7 {
      %cst_16 = arith.constant 0.000000e+00 : f32
      %31 = vector.broadcast %cst_16 : f32 to vector<2x1xf32>
      %c0_17 = arith.constant 0 : index
      %c0_18 = arith.constant 0 : index
      %32 = vector.load %arg7[%c0_17, %c0_18] : memref<2x1xf32, #tpu.memory_space<vmem>>, vector<2x1xf32>
      tpu.vector_store %arg7[%c0_17, %c0_18], %31 {strides = array<i32>} : memref<2x1xf32, #tpu.memory_space<vmem>>, vector<2x1xf32>,
    } else {
    }
    %c0 = arith.constant 0 : index
    %c0_4 = arith.constant 0 : index
    %8 = vector.load %arg3[%c0, %c0_4] : memref<2x128xf32, #tpu.memory_space<vmem>>, vector<2x128xf32>
    %c0_5 = arith.constant 0 : index
    %c0_6 = arith.constant 0 : index
    %9 = vector.load %arg7[%c0_5, %c0_6] : memref<2x1xf32, #tpu.memory_space<vmem>>, vector<2x1xf32>
    %cst = arith.constant dense<0.000000e+00> : vector<2xf32>
    %10 = vector.multi_reduction <add>, %8, %cst [1] : vector<2x128xf32> to vector<2xf32>
    %11 = vector.shape_cast %10 : vector<2xf32> to vector<2x1xf32>
    %12 = arith.addf %9, %11 : vector<2x1xf32>
    %c0_7 = arith.constant 0 : index
    %c0_8 = arith.constant 0 : index
    %13 = vector.load %arg7[%c0_7, %c0_8] : memref<2x1xf32, #tpu.memory_space<vmem>>, vector<2x1xf32>
    tpu.vector_store %arg7[%c0_7, %c0_8], %12 {strides = array<i32>} : memref<2x1xf32, #tpu.memory_space<vmem>>, vector<2x1xf32>,
    %c1_i32 = arith.constant 1 : i32
    %14 = arith.cmpi eq, %arg2, %c1_i32 : i32
    %c0_i32_9 = arith.constant 0 : i32
    %15 = arith.cmpi eq, %arg1, %c0_i32_9 : i32
    %16 = arith.andi %14, %15 : i1
    %17 = arith.extui %16 : i1 to i32
    %c0_i32_10 = arith.constant 0 : i32
    %18 = arith.cmpi ne, %17, %c0_i32_10 : i32
    scf.if %18 {
      %c0_16 = arith.constant 0 : index
      %c0_17 = arith.constant 0 : index
      %31 = vector.load %arg8[%c0_16, %c0_17] : memref<2x128xf32, #tpu.memory_space<vmem>>, vector<2x128xf32>
      %c0_18 = arith.constant 0 : index
      %c0_19 = arith.constant 0 : index
      %32 = vector.load %arg7[%c0_18, %c0_19] : memref<2x1xf32, #tpu.memory_space<vmem>>, vector<2x1xf32>
      %c0_20 = arith.constant 0 : index
      %c0_21 = arith.constant 0 : index
      %33 = vector.load %arg4[%c0_20, %c0_21] : memref<3x128xf32, #tpu.memory_space<vmem>>, vector<1x128xf32>
      %34 = vector.broadcast %32 : vector<2x1xf32> to vector<2x128xf32>
      %35 = vector.broadcast %33 : vector<1x128xf32> to vector<2x128xf32>
      %36 = arith.mulf %34, %35 : vector<2x128xf32>
      %37 = arith.addf %31, %36 : vector<2x128xf32>
      %c0_22 = arith.constant 0 : index
      %c0_23 = arith.constant 0 : index
      %38 = vector.load %arg8[%c0_22, %c0_23] : memref<2x128xf32, #tpu.memory_space<vmem>>, vector<2x128xf32>
      tpu.vector_store %arg8[%c0_22, %c0_23], %37 {strides = array<i32>} : memref<2x128xf32, #tpu.memory_space<vmem>>, vector<2x128xf32>,
    } else {
    }
    %c1_i32_11 = arith.constant 1 : i32
    %19 = arith.cmpi eq, %arg1, %c1_i32_11 : i32
    %20 = arith.andi %14, %19 : i1
    %21 = arith.extui %20 : i1 to i32
    %c0_i32_12 = arith.constant 0 : i32
    %22 = arith.cmpi ne, %21, %c0_i32_12 : i32
    scf.if %22 {
      %c0_16 = arith.constant 0 : index
      %c0_17 = arith.constant 0 : index
      %31 = vector.load %arg8[%c0_16, %c0_17] : memref<2x128xf32, #tpu.memory_space<vmem>>, vector<2x128xf32>
      %c0_18 = arith.constant 0 : index
      %c0_19 = arith.constant 0 : index
      %32 = vector.load %arg7[%c0_18, %c0_19] : memref<2x1xf32, #tpu.memory_space<vmem>>, vector<2x1xf32>
      %c1 = arith.constant 1 : index
      %c0_20 = arith.constant 0 : index
      %33 = vector.load %arg4[%c1, %c0_20] : memref<3x128xf32, #tpu.memory_space<vmem>>, vector<1x128xf32>
      %34 = vector.broadcast %32 : vector<2x1xf32> to vector<2x128xf32>
      %35 = vector.broadcast %33 : vector<1x128xf32> to vector<2x128xf32>
      %36 = arith.mulf %34, %35 : vector<2x128xf32>
      %37 = arith.addf %31, %36 : vector<2x128xf32>
      %c0_21 = arith.constant 0 : index
      %c0_22 = arith.constant 0 : index
      %38 = vector.load %arg8[%c0_21, %c0_22] : memref<2x128xf32, #tpu.memory_space<vmem>>, vector<2x128xf32>
      tpu.vector_store %arg8[%c0_21, %c0_22], %37 {strides = array<i32>} : memref<2x128xf32, #tpu.memory_space<vmem>>, vector<2x128xf32>,
    } else {
    }
    %c2_i32 = arith.constant 2 : i32
    %23 = arith.cmpi eq, %arg1, %c2_i32 : i32
    %24 = arith.andi %14, %23 : i1
    %25 = arith.extui %24 : i1 to i32
    %c0_i32_13 = arith.constant 0 : i32
    %26 = arith.cmpi ne, %25, %c0_i32_13 : i32
    scf.if %26 {
      %c0_16 = arith.constant 0 : index
      %c0_17 = arith.constant 0 : index
      %31 = vector.load %arg8[%c0_16, %c0_17] : memref<2x128xf32, #tpu.memory_space<vmem>>, vector<2x128xf32>
      %c0_18 = arith.constant 0 : index
      %c0_19 = arith.constant 0 : index
      %32 = vector.load %arg7[%c0_18, %c0_19] : memref<2x1xf32, #tpu.memory_space<vmem>>, vector<2x1xf32>
      %c2 = arith.constant 2 : index
      %c0_20 = arith.constant 0 : index
      %33 = vector.load %arg4[%c2, %c0_20] : memref<3x128xf32, #tpu.memory_space<vmem>>, vector<1x128xf32>
      %34 = vector.broadcast %32 : vector<2x1xf32> to vector<2x128xf32>
      %35 = vector.broadcast %33 : vector<1x128xf32> to vector<2x128xf32>
      %36 = arith.mulf %34, %35 : vector<2x128xf32>
      %37 = arith.addf %31, %36 : vector<2x128xf32>
      %c0_21 = arith.constant 0 : index
      %c0_22 = arith.constant 0 : index
      %38 = vector.load %arg8[%c0_21, %c0_22] : memref<2x128xf32, #tpu.memory_space<vmem>>, vector<2x128xf32>
      tpu.vector_store %arg8[%c0_21, %c0_22], %37 {strides = array<i32>} : memref<2x128xf32, #tpu.memory_space<vmem>>, vector<2x128xf32>,
    } else {
    }
    %c2_i32_14 = arith.constant 2 : i32
    %27 = arith.cmpi eq, %arg1, %c2_i32_14 : i32
    %28 = arith.andi %27, %14 : i1
    %29 = arith.extui %28 : i1 to i32
    %c0_i32_15 = arith.constant 0 : i32
    %30 = arith.cmpi ne, %29, %c0_i32_15 : i32
    scf.if %30 {
      %c0_16 = arith.constant 0 : index
      %c0_17 = arith.constant 0 : index
      %31 = vector.load %arg8[%c0_16, %c0_17] : memref<2x128xf32, #tpu.memory_space<vmem>>, vector<2x128xf32>
      %c0_18 = arith.constant 0 : index
      %c0_19 = arith.constant 0 : index
      %32 = vector.load %arg6[%c0_18, %c0_19] : memref<2x128xf32, #tpu.memory_space<vmem>>, vector<2x128xf32>
      tpu.vector_store %arg6[%c0_18, %c0_19], %31 {strides = array<i32>} : memref<2x128xf32, #tpu.memory_space<vmem>>, vector<2x128xf32>,
    } else {
    }
    return
  }
  func.func @transform_0(%arg0: i32, %arg1: i32, %arg2: i32) -> (i32, i32) {
    %c2_i32 = arith.constant 2 : i32
    %0 = arith.muli %arg1, %c2_i32 : i32
    %1 = arith.addi %0, %arg2 : i32
    %c0_i32 = arith.constant 0 : i32
    return %arg0, %1 : i32, i32
  }
  func.func @transform_1(%arg0: i32, %arg1: i32, %arg2: i32) -> (i32, i32) {
    %c0_i32 = arith.constant 0 : i32
    %c0_i32_0 = arith.constant 0 : i32
    %c0_i32_1 = arith.constant 0 : i32
    return %c0_i32, %c0_i32_0 : i32, i32
  }
  func.func @transform_2(%arg0: i32, %arg1: i32, %arg2: i32) -> (i32, i32) {
    %c0_i32 = arith.constant 0 : i32
    %c0_i32_0 = arith.constant 0 : i32
    %c0_i32_1 = arith.constant 0 : i32
    return %c0_i32, %c0_i32_0 : i32, i32
  }
  func.func @transform_3(%arg0: i32, %arg1: i32, %arg2: i32) -> (i32, i32) {
    %c0_i32 = arith.constant 0 : i32
    %c0_i32_0 = arith.constant 0 : i32
    return %arg0, %c0_i32 : i32, i32
  }
}

</mosaic_0001>

<bundles_post_ra>
// kernel: tpu_custom_call.1
= control target key start
LH: loop header
LB: loop body
LE: loop exit
PB: predicated region body
PF: predicated region fallthrough
CT: control target
= control target key end

     0   :  { %s859_s0 = inlined_call_operand.hbm [shape: f32[2,768], index: 0, kind: input, shape index: {}]   ;;  %s860_s1 = inlined_call_operand.hbm [shape: f32[3,128], index: 1, kind: input, shape index: {}]   ;;  %s861_s2 = inlined_call_operand.vmem [shape: f32[1,128], index: 2, kind: input, shape index: {}]   ;;  %s862_s3 = inlined_call_operand.hbm [shape: f32[2,128], index: 3, kind: output, shape index: {}]  }
   0x1   :  { %865 = sst [smem:[#allocation14_spill]] %s860_s1 }
   0x2   :  { %8 = vsyncpa [#allocation5], 0 }
   0x3   :  { %10 = vsyncpa [#allocation5 + $0x1], 0 }
   0x4   :  { %11 = vsyncpa [#allocation8], 0 }
   0x5   :  { %12 = vsyncpa [#allocation6], 0  ;;  %s704_s12 = smov 0   ;;  %s706_s13 = smov 0  }
   0x6   :  { %s708_s14 = smov 0   ;;  %s710_s15 = smov 0  }
   0x7   :  { %s712_s16 = smov 0   ;;  %s714_s17 = smov 0  }
   0x8   :  { %s716_s18 = smov 0   ;;  %s718_s19 = smov 0  }
   0x9 LB: > { %s863_s20 = sadd.s32 4294967295, %s676_s19   ;;  %p63_p0 = scmp.ne.s32.totalorder %s652_s13, %s648_s12  ;;  %s676_s19 = sphi %s718_s19, %s18_s19   ;;  %s672_s18 = sphi %s716_s18, %s880_s18   ;;  %s668_s17 = sphi %s714_s17, %s879_s17   ;;  %s664_s16 = sphi %s712_s16, %s878_s16   ;;  %s660_s15 = sphi %s710_s15, %s877_s15   ;;  %s656_s14 = sphi %s708_s14, %s876_s14   ;;  %s652_s13 = sphi %s706_s13, %s875_s13   ;;  %s648_s12 = sphi %s704_s12, %s874_s12  }
   0xa   : > { %p746_p1 = scmp.eq.s32.totalorder %s863_s20, 0  ;;  %p400_p2 = scmp.ge.s32.totalorder %s676_s19, 1 }
   0xb   : > { %p142_p3 = scmp.lt.s32.totalorder %s676_s19, 7  ;;  %s868_s1 = sld [smem:[#allocation14_spill]] }
   0xc   : > { %p754_p4 = por %p746_p1, %p63_p0  ;;  %s678_s27 = smov [#allocation7]  }
   0xd   : > { %p761_p5 = pnand %p400_p2, %p142_p3  ;;  %s156_s28 = sshll.u32 %s678_s27, 4  ;;  %s157_s28 = int_to_ptr.vmem [resolvable:$true] %s156_s28 }
   0xe   : > { %s30_s29 = sadd.s32 1, %s668_s17  ;;  %s33_s30 = sadd.s32 1, %s672_s18 }
   0xf   : > { %p424_p6 = pneg %p761_p5  ;;  %p31_p8 = scmp.ge.s32.totalorder %s30_s29, 2 }
  0x10   : > { %s398_s4 = sshll.u32 %s672_s18, 1  ;;  %s50_s5 = sadd.s32 1, %s656_s14 }
  0x11   : > { %s154_s25 = sshll.u32 %s868_s1, 4  ;;  %p425_p7 = pnand %p424_p6, %p746_p1  ;;  %s155_s25 = int_to_ptr.hbm [resolvable:$true] %s154_s25 }
  0x12   : > { %s882_s29 = smov (%p31_p8, %s30_s29), 0  ;;  %s884_s30 = smov (!%p31_p8, %s33_s30), %s672_s18 }
  0x13   : > { %427 = dma.hbm_to_vmem [thread:$0]  (!%p425_p7), %s155_s25, 64, %s157_s28, [#allocation8]  }
  0x14   : > { %p57_p9 = scmp.ne.s32.totalorder %s656_s14, %s652_s13  ;;  %p35_p10 = scmp.ge.s32.totalorder %s884_s30, 3 }
  0x15   : > { %p58_p11 = scmp.eq.s32.totalorder %s676_s19, 0  ;;  %s42_s6 = sadd.s32 %s668_s17, %s398_s4 }
  0x16   : > { %s170_s7 = sand.u32 1, %s656_s14   ;;  %s886_s30 = smov (%p35_p10, %s884_s30), 0 }
  0x17   : > { %870 = sst [smem:[#allocation13_spill]] %s886_s30  ;;  %p783_p12 = por %p58_p11, %p57_p9 }
  0x18   : > { %p433_p13 = scmp.lt.s32.totalorder %s676_s19, 6  ;;  %s399_s9 = sshll.u32 %s886_s30, 1 }
  0x19   : > { %s403_s10 = sshll.u32 %s170_s7, 1  ;;  %s44_s11 = sadd.s32 %s399_s9, %s882_s29 }
  0x1a   : > { %s46_s12 = ssub.s32 %s42_s6, %s44_s11  ;;  %s405_s23 = sshll.u32 %s42_s6, 1 }
  0x1b   : > { %p48_p0 = scmp.eq.s32.totalorder %s46_s12, 0  ;;  %s182_s27 = scalar_lea.hbm %s859_s0, %s405_s23 }
  0x1c   : > { %s184_s28 = sshll.u32 %s182_s27, 4  ;;  %s174_s4 = scalar_lea.vmem [#allocation4], %s403_s10  ;;  %s185_s28 = int_to_ptr.hbm [resolvable:$true] %s184_s28 }
  0x1d   : > { %s186_s20 = sshll.u32 %s174_s4, 4  ;;  %p429_p2 = pnand %p433_p13, %p783_p12  ;;  %s187_s20 = int_to_ptr.vmem [resolvable:$true] %s186_s20 }
  0x1e   : > { %s794_s1 = scalar_select %p48_p0, %s656_s14, %s50_s5  }
  0x1f   : > { %s171_s30 = scalar_lea.sflag [#allocation5], %s170_s7  ;;  %195 = sbr.rel (%p761_p5) target bundleno = 583 (0x247), region = 32 }
  0x20   : > { %431 = dma.hbm_to_vmem [thread:$0]  (!%p429_p2), %s185_s28, 32, %s187_s20, %s171_s30  }
  0x21   : > { %s197_s6 = sand.u32 (!%p761_p5), 1, %s652_s13  }
  0x22   : > { %s407_s9 = sshll.u32 (!%p761_p5), %s197_s6, 1  ;;  %s198_s11 = scalar_lea.sflag (!%p761_p5), [#allocation5], %s197_s6 }
  0x23   : > { %s201_s12 = scalar_lea.vmem (!%p761_p5), [#allocation4], %s407_s9 }
  0x24   : > { %635 = dma.done.wait (%p754_p4), %s198_s11, 32  }
  0x25   : > { %637 = vsyncadd (%p754_p4), %s198_s11, 4294967264 }
  0x26   : > { %639 = dma.done.wait (%p746_p1), [#allocation8], 64  }
  0x27   : > { %641 = vsyncadd (%p746_p1), [#allocation8], 4294967232  ;;  %p227_p3 = scmp.eq.s32.totalorder %s664_s16, 0  ;;  %p228_p5 = scmp.eq.s32.totalorder %s660_s15, 0 }
  0x29   : > { %p229_p6 = pnand %p228_p5, %p227_p3 }
  0x2b   : > { %232 = sbr.rel (%p229_p6) target bundleno = 50 (0x32), region = 44 }
  0x30   : > { %v507_v0 = vld [vmem:[%s861_s2] ss:$0 sm:$0xff] }
  0x31   : > { %237 = vst [vmem:[#allocation3] sm:$0x3] %v507_v0 }
  0x32 PF: > { %p409_p4 = scmp.ne.s32.totalorder %s660_s15, 0 }
  0x34   : > { %240 = sbr.rel (%p409_p4) target bundleno = 59 (0x3b), region = 48 }
  0x39   : > { %vm241_vm0 = vcmask 1024   ;;  %v679_v1 = vmov 0.0  }
  0x3a   : > { %242 = vst.msk [vmem:[#allocation2] sm:$0x3] %vm241_vm0, %v679_v1 }
  0x3b PF: > { %v243_v2 = vld [vmem:[%s201_s12] sm:$0x3]  ;;  %vm245_vm1 = vcmask 1041408   ;;  %p252_p1 = scmp.eq.s32.totalorder %s660_s15, 1  ;;  %vm250_vm2 = vcmask 1024  }
  0x3c   : > { %v246_v3 = vsel %vm245_vm1, %v243_v2, 0.0 }
  0x3d   : > { %247 = vadd.xlane.f32.xlu0 %v246_v3  ;;  %p253_p7 = pnand %p252_p1, %p227_p3 }
  0x41   : > { %v244_v4 = vld [vmem:[#allocation2] sm:$0x3] }
  0xaf   : > { %256 = sbr.rel (%p253_p7) target bundleno = 307 (0x133), region = 52 }
  0xb0   : > { %v248_v5 = vpop.xlane.xlu0 %247 }
  0xb1   : > { %v249_v6 = vadd.f32 %v248_v5, %v244_v4 }
  0xb3   : > { %251 = vst.msk [vmem:[#allocation2] sm:$0x3] %vm250_vm2, %v249_v6 }
  0xb4   : > { %v680_v8 = vmov 0   ;;  %v509_v9 = vld [vmem:[#allocation7] ss:$0 sm:$0xff]  ;;  %v257_v11 = vld [vmem:[#allocation3] sm:$0x3] }
  0xb5   : > { %508 = vset.pattern.permute.xlu0 %v680_v8 }
  0xba   : > { %v258_v7 = vld [vmem:[#allocation2] sm:$0x3] }
  0xbb   : > { %262 = vperm.xlu0 %508, %v258_v7  }
 0x12d   : > { %v263_v10 = vpop.permute.xlu0 %262 }
 0x12e   : > { %v266_v12 = vmul.f32 %v509_v9, %v263_v10 }
 0x130   : > { %v267_v13 = vadd.f32 %v266_v12, %v257_v11 }
 0x132   : > { %268 = vst [vmem:[#allocation3] sm:$0x3] %v267_v13 }
 0x133 PF: > { %p269_p8 = scmp.eq.s32.totalorder %s664_s16, 1 }
 0x135   : > { %p270_p9 = pnand %p269_p8, %p252_p1 }
 0x137   : > { %273 = sbr.rel (%p270_p9) target bundleno = 438 (0x1b6), region = 56 }
 0x13c   : > { %v275_v14 = vld [vmem:[#allocation2] sm:$0x3]  ;;  %v681_v15 = vmov 0   ;;  %v511_v16 = vld [vmem:[#allocation7 + $0x1] ss:$0 sm:$0xff] }
 0x13d   : > { %510 = vset.pattern.permute.xlu0 %v681_v15  ;;  %v274_v18 = vld [vmem:[#allocation3] sm:$0x3] }
 0x13e   : > { %279 = vperm.xlu0 %510, %v275_v14  }
 0x1b0   : > { %v280_v17 = vpop.permute.xlu0 %279 }
 0x1b1   : > { %v283_v19 = vmul.f32 %v511_v16, %v280_v17 }
 0x1b3   : > { %v284_v20 = vadd.f32 %v283_v19, %v274_v18 }
 0x1b5   : > { %285 = vst [vmem:[#allocation3] sm:$0x3] %v284_v20 }
 0x1b6 PF: > { %p286_p10 = scmp.eq.s32.totalorder %s664_s16, 2 }
 0x1b8   : > { %p287_p11 = pnand %p286_p10, %p252_p1 }
 0x1ba   : > { %290 = sbr.rel (%p287_p11) target bundleno = 577 (0x241), region = 60 }
 0x1bf   : > { %v292_v21 = vld [vmem:[#allocation2] sm:$0x3]  ;;  %v682_v22 = vmov 0   ;;  %v513_v23 = vld [vmem:[#allocation7 + $0x2] ss:$0 sm:$0xff] }
 0x1c0   : > { %512 = vset.pattern.permute.xlu0 %v682_v22  ;;  %v291_v25 = vld [vmem:[#allocation3] sm:$0x3] }
 0x1c1   : > { %296 = vperm.xlu0 %512, %v292_v21  }
 0x233   : > { %v297_v24 = vpop.permute.xlu0 %296 }
 0x234   : > { %v300_v26 = vmul.f32 %v513_v23, %v297_v24 }
 0x236   : > { %v301_v27 = vadd.f32 %v300_v26, %v291_v25 }
 0x238   : > { %302 = vst [vmem:[#allocation3] sm:$0x3] %v301_v27 }
 0x23f   : > { %v303_v28 = vld [vmem:[#allocation3] sm:$0x3] }
 0x240   : > { %304 = vst [vmem:[#allocation9] sm:$0x3] %v303_v28 }
 0x241 PF: > { %s872_s21 = sadd.s32 4294967295, %s676_s19   ;;  %s315_s22 = sshll.u32 %s862_s3, 4  ;;  %s316_s22 = int_to_ptr.hbm [resolvable:$true] %s315_s22 }
 0x242   : > { %p435_p12 = scmp.eq.s32.totalorder %s872_s21, 5  ;;  %s683_s30 = smov [#allocation9]  }
 0x243   : > { %s313_s5 = sshll.u32 %s683_s30, 4  ;;  %s314_s5 = int_to_ptr.vmem [resolvable:$true] %s313_s5 }
 0x244   : > { %421 = dma.vmem_to_hbm [thread:$0]  (%p435_p12), %s314_s5, 32, %s316_s22, [#allocation6]  }
 0x245   : > { %643 = dma.done.wait (%p435_p12), [#allocation6], 32  }
 0x246   : > { %645 = vsyncadd (%p435_p12), [#allocation6], 4294967264 }
 0x247 PF: > { %s18_s19 = sadd.s32 1, %s676_s19   ;;  %s873_s7 = sld [smem:[#allocation13_spill]] }
 0x248   : > { %p15_p13 = scmp.ge.s32.totalorder %s18_s19, 8   ;;  %s874_s12 = smov %s652_s13 }
 0x249   : > { %s875_s13 = smov %s656_s14  ;;  %s876_s14 = smov %s794_s1 }
 0x24a   : > { %s877_s15 = smov %s668_s17  ;;  %s878_s16 = smov %s672_s18 }
 0x24b   : > { %s879_s17 = smov %s882_s29  ;;  %17 = sbr.rel (!%p15_p13) target bundleno = 9 (0x9), region = 94 }
 0x24d   : > { %s880_s18 = smov %s873_s7 }
 0x250   :  { %329 = vsyncpa [#allocation5], 1 }
 0x251   :  { %331 = vsyncpa [#allocation5 + $0x1], 1 }
 0x252   :  { %332 = vsyncpa [#allocation8], 1 }
 0x253   :  { %333 = vsyncpa [#allocation6], 1 }
 0x254   :  { %335 = vsyncpa [#allocation6 + $0x1], 1 }

</bundles_post_ra>
